<compile_context>
chip_gen: v6e
topology: v6e:2x2x1
jax: 0.10.0
libtpu: 0.0.40
codegen_flags: <defaults>
</compile_context>

<pallas_src>
import math
from functools import partial

import numpy as np
import jax
import jax.numpy as jnp
from jax.experimental import pallas as pl
from jax.experimental.pallas import tpu as pltpu

NEG_BIAS = -1e30  # additive stand-in for masked_fill_(mask, -inf)


# ------------------------------------------------------------------- kernel ---

def _sdpa_kernel(*refs, scale, matmul_dtype, has_mask, emit_attention,
                 fold_scale_into_q):
    """One grid step: a block of `gb` head-groups x one query tile, full (Lk, D) extent.

    refs layout: q, k, v, [mask], ctx, [att]
    """
    idx = 0
    q_ref = refs[idx]; idx += 1
    k_ref = refs[idx]; idx += 1
    v_ref = refs[idx]; idx += 1
    mask_ref = None
    if has_mask:
        mask_ref = refs[idx]; idx += 1
    ctx_ref = refs[idx]; idx += 1
    att_ref = refs[idx] if emit_attention else None

    # scores: (gb, tq, Lk) -- batched MXU matmul, f32 accumulation.
    q = q_ref[...]
    if fold_scale_into_q:
        # (gb, tq, D) multiply is cheaper than the (gb, tq, Lk) epilogue when Lk > D.
        q = q.astype(jnp.float32) * jnp.float32(scale)
    q = q.astype(matmul_dtype)
    k = k_ref[...].astype(matmul_dtype)
    s = jax.lax.dot_general(q, k, (((2,), (2,)), ((0,), (0,))),
                            preferred_element_type=jnp.float32)
    if (not fold_scale_into_q) and scale != 1.0:
        s = s * jnp.float32(scale)
    if has_mask:
        # compact {0,1} key mask; broadcast over the query axis happens in-kernel.
        s = s + mask_ref[...].astype(jnp.float32) * jnp.float32(NEG_BIAS)

    # numerically-stable softmax over keys, f32 on the VPU; reciprocal on the EUP.
    smax = jnp.max(s, axis=-1, keepdims=True)
    e = jnp.exp(s - smax)
    inv = pl.reciprocal(jnp.sum(e, axis=-1, keepdims=True), approx=True)

    v = v_ref[...].astype(matmul_dtype)
    if emit_attention:
        p = e * inv
        att_ref[...] = p.astype(att_ref.dtype)
        ctx = jax.lax.dot_general(p.astype(matmul_dtype), v,
                                  (((2,), (1,)), ((0,), (0,))),
                                  preferred_element_type=jnp.float32)
    else:
        # deferred normalization: scale the (gb, tq, Dv) context instead of the
        # (gb, tq, Lk) probabilities.
        ctx = jax.lax.dot_general(e.astype(matmul_dtype), v,
                                  (((2,), (1,)), ((0,), (0,))),
                                  preferred_element_type=jnp.float32)
        ctx = ctx * inv
    ctx_ref[...] = ctx.astype(ctx_ref.dtype)


# ------------------------------------------------------------- tiling picker ---

def _tpu_vmem_and_cores():
    """(per-TensorCore VMEM bytes, TensorCores per chip) with safe fallbacks."""
    vmem_cap = 128 << 20     # v5e / v6e
    num_cores = 1
    try:
        kind = jax.devices()[0].device_kind.lower()
    except Exception:
        kind = ""
    if "v7" in kind:
        vmem_cap = 64 << 20  # v7x: 64 MiB per TensorCore
        num_cores = 2        # 2 TCs/chip -> grid needs >= 2 parallel steps
    try:
        cap = getattr(pltpu.get_tpu_info(), "vmem_capacity_bytes", None)
        if cap:
            vmem_cap = int(cap)
    except Exception:
        pass
    return vmem_cap, num_cores


def _largest_divisor_leq(n, x):
    for d in range(min(n, x), 0, -1):
        if n % d == 0:
            return d
    return 1


def _pick_tiling(G, Lq, Lk, D, Dv, *, in_itemsize, out_itemsize, att_itemsize,
                 mask_q, budget_bytes):
    """(gb, tq): largest head-group block (and, if needed, query tile) whose
    double-buffered block I/O plus f32 softmax temporaries fit the VMEM budget."""
    def fits(gb, tq):
        mq_blk = 0 if mask_q == 0 else (1 if mask_q == 1 else tq)
        io = gb * (tq * D + Lk * D + Lk * Dv) * in_itemsize \
             + gb * mq_blk * Lk * 2                       # bf16 mask block
        out = gb * tq * Dv * out_itemsize + gb * tq * Lk * att_itemsize
        tmp = 2 * gb * tq * Lk * 4                        # live f32 score/exp slabs
        return 2 * (io + out) + tmp <= budget_bytes       # 2x: double-buffered pipeline

    for gb in sorted((d for d in range(1, G + 1) if G % d == 0), reverse=True):
        if fits(gb, Lq):
            return gb, Lq
    # a single head-group is still too big: tile the query axis.
    for tq in (2048, 1024, 512, 256, 128, 64, 32, 16, 8):
        if tq < Lq and fits(1, tq):
            return 1, tq
    # TODO(synk): flash-style Lk streaming (online softmax) for very long key
    # sequences; not needed at HITA shapes.
    raise ValueError("attention tile does not fit in VMEM even at gb=1, tq=8 "
                     f"(Lq={Lq}, Lk={Lk}, D={D}, Dv={Dv})")


# ------------------------------------------------------------------ wrapper ---

def scaled_dot_product_attention(q, k, v, scale=None, attn_mask=None, *,
                                 return_attention=True,
                                 matmul_dtype=jnp.bfloat16,
                                 attention_dtype=None,
                                 vmem_budget_bytes=None):
    """Pallas TPU ScaledDotProductAttention.forward.

    q: (G, Lq, D), k: (G, Lk, D), v: (G, Lk, Dv); attn_mask broadcastable to
    (G, Lq, Lk) with nonzero/True = masked out.  Returns (context, attention)
    like the torch module (attention is None when return_attention=False).
    """
    # TODO(synk): nn.Dropout with p > 0 (training-time) is not implemented; the
    # module default attention_dropout=0.0 is an identity.
    q = jnp.asarray(q); k = jnp.asarray(k); v = jnp.asarray(v)
    G, Lq, D = q.shape
    Gk, Lk, Dk = k.shape
    Gv, Lv, Dv = v.shape
    assert G == Gk == Gv and D == Dk and Lk == Lv, "inconsistent bmm shapes"
    out_dtype = q.dtype
    att_dtype = jnp.dtype(attention_dtype) if attention_dtype is not None else jnp.dtype(out_dtype)

    # torch does `if scale:` -> falsy scale (None or 0.0) means no scaling.
    scale_val = float(scale) if scale else 1.0
    fold_scale_into_q = (scale_val != 1.0) and (Lk > D)

    has_mask = attn_mask is not None
    inputs = [q, k, v]
    mask_q = 0
    if has_mask:
        m = jnp.asarray(attn_mask)
        if m.ndim < 3:
            m = jnp.reshape(m, (1,) * (3 - m.ndim) + m.shape)
        assert m.shape[1] in (1, Lq) and m.shape[2] in (1, Lk), "mask not broadcastable"
        mask_q = m.shape[1]            # keep a key-padding mask compact: (G, 1, Lk)
        inputs.append(jnp.broadcast_to(m != 0, (G, mask_q, Lk)).astype(jnp.bfloat16))

    vmem_cap, num_cores = _tpu_vmem_and_cores()
    if vmem_budget_bytes is None:
        # ~64 MiB on v5e/v6e (128 MiB VMEM), ~45 MiB on v7x (64 MiB/TC).
        vmem_budget_bytes = min(64 << 20, int(0.7 * vmem_cap))

    gb, tq = _pick_tiling(
        G, Lq, Lk, D, Dv,
        in_itemsize=q.dtype.itemsize,
        out_itemsize=jnp.dtype(out_dtype).itemsize,
        att_itemsize=att_dtype.itemsize if return_attention else 0,
        mask_q=mask_q, budget_bytes=vmem_budget_bytes)
    n_q = pl.cdiv(Lq, tq)
    # v7x: keep both TensorCores busy -> at least `num_cores` parallel grid steps.
    while num_cores > 1 and (G // gb) * n_q < num_cores and gb > 1:
        gb = _largest_divisor_leq(G, gb - 1)
    grid = (G // gb, n_q)

    in_specs = [pl.BlockSpec((gb, tq, D), lambda g, qi: (g, qi, 0)),
                pl.BlockSpec((gb, Lk, D), lambda g, qi: (g, 0, 0)),
                pl.BlockSpec((gb, Lk, Dv), lambda g, qi: (g, 0, 0))]
    if has_mask:
        if mask_q == 1:
            in_specs.append(pl.BlockSpec((gb, 1, Lk), lambda g, qi: (g, 0, 0)))
        else:
            in_specs.append(pl.BlockSpec((gb, tq, Lk), lambda g, qi: (g, qi, 0)))

    out_specs = [pl.BlockSpec((gb, tq, Dv), lambda g, qi: (g, qi, 0))]
    out_shape = [jax.ShapeDtypeStruct((G, Lq, Dv), out_dtype)]
    if return_attention:
        out_specs.append(pl.BlockSpec((gb, tq, Lk), lambda g, qi: (g, qi, 0)))
        out_shape.append(jax.ShapeDtypeStruct((G, Lq, Lk), att_dtype))

    kern = partial(_sdpa_kernel, scale=scale_val, matmul_dtype=matmul_dtype,
                   has_mask=has_mask, emit_attention=return_attention,
                   fold_scale_into_q=fold_scale_into_q)

    # NOTE: at tiny HITA shapes (Lk=16, Dv=64) the last dims underfill the 128-wide
    # vreg lanes; packing several head-groups along the lane axis would be a further
    # (layout-level) optimization not applied here.
    outs = pl.pallas_call(
        kern,
        grid_spec=pltpu.PrefetchScalarGridSpec(
            num_scalar_prefetch=0,
            grid=grid,
            in_specs=in_specs,
            out_specs=tuple(out_specs)),
        out_shape=tuple(out_shape),
        compiler_params=pltpu.CompilerParams(
            dimension_semantics=("parallel", "parallel"),
            vmem_limit_bytes=int(min(0.9 * vmem_cap,
                                     vmem_budget_bytes + (16 << 20)))),
    )(*inputs)

    if return_attention:
        context, attention = outs
        return context, attention
    return outs[0], None


# ---------------------------------------------------------------- reference ---

def _sdpa_reference(q, k, v, scale=None, attn_mask=None):
    """Pure-JAX f32 replica of the torch module (for correctness check)."""
    s = jnp.einsum('gqd,gkd->gqk', q, k)
    if scale:
        s = s * scale
    if attn_mask is not None:
        s = jnp.where(attn_mask, -jnp.inf, s)
    p = jax.nn.softmax(s, axis=2)
    ctx = jnp.einsum('gqk,gkd->gqd', p, v)
    return ctx, p


# --------------------------------------------------------------------- main ---

if __name__ == "__main__":
    # Shapes implied by the HITA encoder usage of this module:
    # G = batch * num_heads groups, Lq = Lk = #visits, D = per-head dim.
    B, H, V, dph = 2, 4, 16, 64
    G = B * H

    key = jax.random.PRNGKey(0)
    kq, kk, kv = jax.random.split(key, 3)
    q = jax.random.normal(kq, (G, V, dph), jnp.float32)
    k = jax.random.normal(kk, (G, V, dph), jnp.float32)
    v = jax.random.normal(kv, (G, V, dph), jnp.float32)
    scale = 1.0 / math.sqrt(dph)

    # Key-padding mask (True = masked), constant over query rows -> passed compactly
    # as (G, 1, V).  No row is fully masked, so -inf masked_fill and the additive
    # -1e30 bias produce the same softmax.
    valid_len = np.array([V, V - 4], dtype=np.int32)                 # per batch element
    pad = (np.arange(V)[None, :] >= valid_len[:, None])              # (B, V) bool
    attn_mask_b = pad[:, None, :]                                    # (B, 1, V)
    attn_mask = jnp.asarray(np.repeat(attn_mask_b, H, axis=0))       # (G, 1, V)

    context, attention = scaled_dot_product_attention(q, k, v, scale=scale,
                                                      attn_mask=attn_mask)
    context = jax.block_until_ready(context)
    attention = jax.block_until_ready(attention)

    # shape / sanity checks
    assert context.shape == (G, V, dph)
    assert attention.shape == (G, V, V)
    assert bool(jnp.all(jnp.isfinite(context)))
    assert bool(jnp.all(jnp.isfinite(attention)))
    # softmax rows sum to ~1 (bf16 matmuls + EUP approx reciprocal -> loose atol)
    np.testing.assert_allclose(np.asarray(jnp.sum(attention, axis=-1)), 1.0,
                               rtol=0.0, atol=1e-2)
    # masked keys get ~zero probability
    masked_p = jnp.where(jnp.broadcast_to(attn_mask, attention.shape), attention, 0.0)
    assert float(jnp.max(masked_p)) < 1e-6

    # numerical check vs. f32 reference (bf16 matmul inputs -> loose tolerance)
    ref_ctx, ref_att = _sdpa_reference(q, k, v, scale=scale, attn_mask=attn_mask)
    np.testing.assert_allclose(np.asarray(attention), np.asarray(ref_att),
                               rtol=3e-2, atol=3e-2)
    np.testing.assert_allclose(np.asarray(context), np.asarray(ref_ctx),
                               rtol=3e-2, atol=3e-2)

    # also exercise the no-mask / no-scale / no-attention-output (deferred-norm) path
    ctx2, att2 = scaled_dot_product_attention(q, k, v, return_attention=False)
    ctx2 = jax.block_until_ready(ctx2)
    assert att2 is None and ctx2.shape == (G, V, dph)
    assert bool(jnp.all(jnp.isfinite(ctx2)))
    ref_ctx2, _ = _sdpa_reference(q, k, v)
    np.testing.assert_allclose(np.asarray(ctx2), np.asarray(ref_ctx2),
                               rtol=3e-2, atol=3e-2)

    print("KERNEL_OK")
</pallas_src>

<mosaic_0001>
module attributes {stable_mosaic.version = 11 : i64} {
  func.func @_sdpa_kernel(%arg0: i32, %arg1: i32, %arg2: memref<8x16x64xf32, #tpu.memory_space<vmem>>, %arg3: memref<8x16x64xf32, #tpu.memory_space<vmem>>, %arg4: memref<8x16x64xf32, #tpu.memory_space<vmem>>, %arg5: memref<8x1x16xbf16, #tpu.memory_space<vmem>>, %arg6: memref<8x16x64xf32, #tpu.memory_space<vmem>>, %arg7: memref<8x16x16xf32, #tpu.memory_space<vmem>>) attributes {dimension_semantics = [#tpu.dimension_semantics<parallel>, #tpu.dimension_semantics<parallel>], iteration_bounds = array<i64: 1, 1>, scalar_prefetch = 0 : i64, scratch_operands = 0 : i64, tpu.core_type = #tpu.core_type<tc>, window_params = [{transform_indices = @transform_0, window_bounds = array<i64: 8, 16, 64>}, {transform_indices = @transform_1, window_bounds = array<i64: 8, 16, 64>}, {transform_indices = @transform_2, window_bounds = array<i64: 8, 16, 64>}, {transform_indices = @transform_3, window_bounds = array<i64: 8, 1, 16>}, {transform_indices = @transform_4, window_bounds = array<i64: 8, 16, 64>}, {transform_indices = @transform_5, window_bounds = array<i64: 8, 16, 16>}]} {
    %c0 = arith.constant 0 : index
    %c0_0 = arith.constant 0 : index
    %c0_1 = arith.constant 0 : index
    %0 = vector.load %arg2[%c0, %c0_0, %c0_1] : memref<8x16x64xf32, #tpu.memory_space<vmem>>, vector<8x16x64xf32>
    %1 = arith.truncf %0 : vector<8x16x64xf32> to vector<8x16x64xbf16>
    %c0_2 = arith.constant 0 : index
    %c0_3 = arith.constant 0 : index
    %c0_4 = arith.constant 0 : index
    %2 = vector.load %arg3[%c0_2, %c0_3, %c0_4] : memref<8x16x64xf32, #tpu.memory_space<vmem>>, vector<8x16x64xf32>
    %3 = arith.truncf %2 : vector<8x16x64xf32> to vector<8x16x64xbf16>
    %cst = arith.constant dense<0.000000e+00> : vector<8x16x16xf32>
    %4 = tpu.matmul %1, %3, %cst {dimension_numbers = #tpu.dot_dimension_numbers<[2], [2], [1], [1], [0, 0, 0, 1, 1, 1], [0], [0]>} : vector<8x16x64xbf16>, vector<8x16x64xbf16>, vector<8x16x16xf32> -> vector<8x16x16xf32>
    %cst_5 = arith.constant 1.250000e-01 : f32
    %5 = vector.broadcast %cst_5 : f32 to vector<8x16x16xf32>
    %6 = arith.mulf %4, %5 : vector<8x16x16xf32>
    %c0_6 = arith.constant 0 : index
    %c0_7 = arith.constant 0 : index
    %c0_8 = arith.constant 0 : index
    %7 = vector.load %arg5[%c0_6, %c0_7, %c0_8] : memref<8x1x16xbf16, #tpu.memory_space<vmem>>, vector<8x1x16xbf16>
    %8 = arith.extf %7 : vector<8x1x16xbf16> to vector<8x1x16xf32>
    %cst_9 = arith.constant -1.000000e+30 : f32
    %9 = vector.broadcast %cst_9 : f32 to vector<8x1x16xf32>
    %10 = arith.mulf %8, %9 : vector<8x1x16xf32>
    %11 = vector.broadcast %10 : vector<8x1x16xf32> to vector<8x16x16xf32>
    %12 = arith.addf %6, %11 : vector<8x16x16xf32>
    %cst_10 = arith.constant dense<0xFF800000> : vector<8x16xf32>
    %13 = vector.multi_reduction <maximumf>, %12, %cst_10 [2] : vector<8x16x16xf32> to vector<8x16xf32>
    %14 = vector.shape_cast %13 : vector<8x16xf32> to vector<8x16x1xf32>
    %15 = vector.broadcast %14 : vector<8x16x1xf32> to vector<8x16x16xf32>
    %16 = arith.subf %12, %15 : vector<8x16x16xf32>
    %17 = math.exp %16 : vector<8x16x16xf32>
    %cst_11 = arith.constant dense<0.000000e+00> : vector<8x16xf32>
    %18 = vector.multi_reduction <add>, %17, %cst_11 [2] : vector<8x16x16xf32> to vector<8x16xf32>
    %19 = vector.shape_cast %18 : vector<8x16xf32> to vector<8x16x1xf32>
    %20 = tpu.reciprocal %19 {approx = true} : vector<8x16x1xf32> -> vector<8x16x1xf32>
    %c0_12 = arith.constant 0 : index
    %c0_13 = arith.constant 0 : index
    %c0_14 = arith.constant 0 : index
    %21 = vector.load %arg4[%c0_12, %c0_13, %c0_14] : memref<8x16x64xf32, #tpu.memory_space<vmem>>, vector<8x16x64xf32>
    %22 = arith.truncf %21 : vector<8x16x64xf32> to vector<8x16x64xbf16>
    %23 = vector.broadcast %20 : vector<8x16x1xf32> to vector<8x16x16xf32>
    %24 = arith.mulf %17, %23 : vector<8x16x16xf32>
    %c0_15 = arith.constant 0 : index
    %c0_16 = arith.constant 0 : index
    %c0_17 = arith.constant 0 : index
    %25 = vector.load %arg7[%c0_15, %c0_16, %c0_17] : memref<8x16x16xf32, #tpu.memory_space<vmem>>, vector<8x16x16xf32>
    tpu.vector_store %arg7[%c0_15, %c0_16, %c0_17], %24 {strides = array<i32>} : memref<8x16x16xf32, #tpu.memory_space<vmem>>, vector<8x16x16xf32>,
    %26 = arith.truncf %24 : vector<8x16x16xf32> to vector<8x16x16xbf16>
    %cst_18 = arith.constant dense<0.000000e+00> : vector<8x16x64xf32>
    %27 = tpu.matmul %26, %22, %cst_18 {dimension_numbers = #tpu.dot_dimension_numbers<[2], [1], [1], [2], [0, 0, 0, 1, 1, 2], [0], [0]>} : vector<8x16x16xbf16>, vector<8x16x64xbf16>, vector<8x16x64xf32> -> vector<8x16x64xf32>
    %c0_19 = arith.constant 0 : index
    %c0_20 = arith.constant 0 : index
    %c0_21 = arith.constant 0 : index
    %28 = vector.load %arg6[%c0_19, %c0_20, %c0_21] : memref<8x16x64xf32, #tpu.memory_space<vmem>>, vector<8x16x64xf32>
    tpu.vector_store %arg6[%c0_19, %c0_20, %c0_21], %27 {strides = array<i32>} : memref<8x16x64xf32, #tpu.memory_space<vmem>>, vector<8x16x64xf32>,
    return
  }
  func.func @transform_0(%arg0: i32, %arg1: i32) -> (i32, i32, i32) {
    %c0_i32 = arith.constant 0 : i32
    %c0_i32_0 = arith.constant 0 : i32
    return %arg0, %arg1, %c0_i32 : i32, i32, i32
  }
  func.func @transform_1(%arg0: i32, %arg1: i32) -> (i32, i32, i32) {
    %c0_i32 = arith.constant 0 : i32
    %c0_i32_0 = arith.constant 0 : i32
    %c0_i32_1 = arith.constant 0 : i32
    return %arg0, %c0_i32, %c0_i32_0 : i32, i32, i32
  }
  func.func @transform_2(%arg0: i32, %arg1: i32) -> (i32, i32, i32) {
    %c0_i32 = arith.constant 0 : i32
    %c0_i32_0 = arith.constant 0 : i32
    %c0_i32_1 = arith.constant 0 : i32
    return %arg0, %c0_i32, %c0_i32_0 : i32, i32, i32
  }
  func.func @transform_3(%arg0: i32, %arg1: i32) -> (i32, i32, i32) {
    %c0_i32 = arith.constant 0 : i32
    %c0_i32_0 = arith.constant 0 : i32
    %c0_i32_1 = arith.constant 0 : i32
    return %arg0, %c0_i32, %c0_i32_0 : i32, i32, i32
  }
  func.func @transform_4(%arg0: i32, %arg1: i32) -> (i32, i32, i32) {
    %c0_i32 = arith.constant 0 : i32
    %c0_i32_0 = arith.constant 0 : i32
    return %arg0, %arg1, %c0_i32 : i32, i32, i32
  }
  func.func @transform_5(%arg0: i32, %arg1: i32) -> (i32, i32, i32) {
    %c0_i32 = arith.constant 0 : i32
    %c0_i32_0 = arith.constant 0 : i32
    return %arg0, %arg1, %c0_i32 : i32, i32, i32
  }
}

</mosaic_0001>

<bundles_post_ra>
// kernel: tpu_custom_call.1
= control target key start
LH: loop header
LB: loop body
LE: loop exit
PB: predicated region body
PF: predicated region fallthrough
CT: control target
= control target key end

     0   :  { %11 = vsyncpa [#allocation3], 0  ;;  %s1895_s0 = inlined_call_operand.hbm [shape: f32[8,16,64], index: 0, kind: input, shape index: {}]   ;;  %s1896_s1 = inlined_call_operand.hbm [shape: f32[8,16,64], index: 1, kind: input, shape index: {}]   ;;  %s1897_s2 = inlined_call_operand.hbm [shape: f32[8,16,64], index: 2, kind: input, shape index: {}]   ;;  %s1898_s3 = inlined_call_operand.vmem [shape: bf16[8,1,16], index: 3, kind: input, shape index: {}]   ;;  %s1899_s4 = inlined_call_operand.hbm [shape: f32[8,16,64], index: 4, kind: output, shape index: {0}]   ;;  %s1900_s5 = inlined_call_operand.hbm [shape: f32[8,16,16], index: 5, kind: output, shape index: {1}]  }
   0x1   :  { %12 = vsyncpa [#allocation6], 0 }
   0x2   :  { %13 = vsyncpa [#allocation4], 0 }
   0x3   :  { %14 = vsyncpa [#allocation10], 0  ;;  %s1528_s18 = smov [#allocation5]   ;;  %s1529_s20 = smov [#allocation2]  }
   0x4   :  { %s32_s19 = sshll.u32 %s1528_s18, 4  ;;  %s20_s21 = sshll.u32 %s1529_s20, 4  ;;  %s33_s19 = int_to_ptr.vmem [resolvable:$true] %s32_s19  ;;  %s21_s21 = int_to_ptr.vmem [resolvable:$true] %s20_s21 }
   0x5   :  { %s1428_s22 = scalar_lea.vmem %s33_s19, 2048  ;;  %p1433_p1 = scmp.lt.s32.totalorder %s33_s19, %s33_s19 }
   0x6   :  { %p1429_p0 = scmp.ne.s32.totalorder %s33_s19, %s1428_s22  ;;  %p1434_p2 = scmp.lt.s32.totalorder %s1428_s22, %s1428_s22 }
   0x8   :  { %p1435_p3 = por %p1434_p2, %p1433_p1 }
   0xa   :  { %p1436_p4 = pnand %p1435_p3, %p1429_p0 }
   0xc   :  { %1439 = shalt.err (!%p1436_p4)
}
   0xd   :  { %s1530_s23 = smov 128   ;;  %s1531_s24 = smov 8  }
   0xe   :  { %38 = dma.hbm_to_vmem [thread:$0]  %s1896_s1, 2048, %s33_s19, [#allocation6], %s1530_s23, %s1530_s23, %s1531_s24  }
   0xf   :  { %s1448_s27 = scalar_lea.vmem %s21_s21, 2048  ;;  %p1453_p6 = scmp.lt.s32.totalorder %s21_s21, %s21_s21 }
  0x10   :  { %p1449_p5 = scmp.ne.s32.totalorder %s21_s21, %s1448_s27  ;;  %p1454_p7 = scmp.lt.s32.totalorder %s1448_s27, %s1448_s27 }
  0x12   :  { %p1455_p8 = por %p1454_p7, %p1453_p6 }
  0x14   :  { %p1456_p9 = pnand %p1455_p8, %p1449_p5 }
  0x16   :  { %1459 = shalt.err (!%p1456_p9)
}
  0x17   :  { %26 = dma.hbm_to_vmem [thread:$0]  %s1895_s0, 2048, %s21_s21, [#allocation3], %s1530_s23, %s1530_s23, %s1531_s24  }
  0x18   :  { %s1532_s30 = smov [#allocation7]  }
  0x19   :  { %s44_s6 = sshll.u32 %s1532_s30, 4  ;;  %s45_s6 = int_to_ptr.vmem [resolvable:$true] %s44_s6 }
  0x1a   :  { %s1468_s7 = scalar_lea.vmem %s45_s6, 2048  ;;  %p1473_p11 = scmp.lt.s32.totalorder %s45_s6, %s45_s6 }
  0x1b   :  { %p1469_p10 = scmp.ne.s32.totalorder %s45_s6, %s1468_s7  ;;  %p1474_p12 = scmp.lt.s32.totalorder %s1468_s7, %s1468_s7 }
  0x1d   :  { %p1475_p13 = por %p1474_p12, %p1473_p11 }
  0x1f   :  { %p1476_p0 = pnand %p1475_p13, %p1469_p10 }
  0x21   :  { %1479 = shalt.err (!%p1476_p0)
}
  0x22   :  { %50 = dma.hbm_to_vmem [thread:$0]  %s1897_s2, 2048, %s45_s6, [#allocation6], %s1530_s23, %s1530_s23, %s1531_s24  }
  0x23   :  { %1520 = dma.done.wait [#allocation3], 2048  }
  0x24   :  { %1521 = vsyncadd [#allocation3], 4294965248 }
  0x25   :  { %1522 = dma.done.wait [#allocation6], 4096  }
  0x26   :  { %1523 = vsyncadd [#allocation6], 4294963200  ;;  %v1533_v0 = vmov 0.0   ;;  %vm1534_vm0 = vmmov 0   ;;  %v87_v1 = vld [vmem:[#allocation5] sm:$0xff]  ;;  %v88_v2 = vld [vmem:[#allocation5 + $0x8] sm:$0xff]  ;;  %v528_v57 = vlaneseq }
  0x27   :  { %1251 = vmatprep.subr.bf16.mxu0 %v1533_v0  ;;  %1257 = vmatprep.subr.bf16.mxu1 %v1533_v0  ;;  %vm111_vm1 = vcmask 523264   ;;  %v89_v3 = vld [vmem:[#allocation5 + $0x10] sm:$0xff]  ;;  %v103_v4 = vpack.c.bf16 %v88_v2, %v87_v1  ;;  %v90_v5 = vld [vmem:[#allocation5 + $0x18] sm:$0xff]  ;;  %v91_v7 = vld [vmem:[#allocation5 + $0x20] sm:$0xff]  ;;  %vm576_vm2 = vcmask 130048  }
  0x28   :  { %1253 = vmatprep.mubr.msk.bf16.mxu0 %vm1534_vm0, %v1533_v0  ;;  %1259 = vmatprep.mubr.msk.bf16.mxu1 %vm1534_vm0, %v1533_v0  ;;  %v104_v6 = vpack.c.bf16 %v90_v5, %v89_v3  ;;  %v92_v9 = vld [vmem:[#allocation5 + $0x28] sm:$0xff]  ;;  %v93_v10 = vld [vmem:[#allocation5 + $0x30] sm:$0xff]  ;;  %v94_v11 = vld [vmem:[#allocation5 + $0x38] sm:$0xff]  ;;  %v529_v60 = vshrl.u32 %v528_v57, 7 }
  0x29   :  { %v116_v8 = vsel %vm111_vm1, %v103_v4, 0  ;;  %v63_v13 = vld [vmem:[#allocation2] sm:$0xff]  ;;  %v64_v14 = vld [vmem:[#allocation2 + $0x8] sm:$0xff]  ;;  %v65_v15 = vld [vmem:[#allocation2 + $0x10] sm:$0xff]  ;;  %v105_v17 = vpack.c.bf16 %v92_v9, %v91_v7  ;;  %v106_v18 = vpack.c.bf16 %v94_v11, %v93_v10 }
  0x2a   :  { %1252 = vmatpush3.bf16.xpose.msra.mxu0 %v116_v8  ;;  %v163_v12 = vsel %vm111_vm1, %v104_v6, 0  ;;  %v66_v16 = vld [vmem:[#allocation2 + $0x18] sm:$0xff]  ;;  %v79_v19 = vpack.c.bf16 %v64_v14, %v63_v13  ;;  %v95_v23 = vld [vmem:[#allocation5 + $0x40] sm:$0xff]  ;;  %v96_v24 = vld [vmem:[#allocation5 + $0x48] sm:$0xff]  ;;  %v1637_v63 = vsub.s32 0, %v529_v60 }
  0x2b   :  { %1258 = vmatpush3.bf16.xpose.msra.mxu1 %v163_v12  ;;  %1263 = vmatprep.subr.bf16.mxu0 %v1533_v0  ;;  %v80_v20 = vpack.c.bf16 %v66_v16, %v65_v15  ;;  %v210_v21 = vsel %vm111_vm1, %v105_v17, 0  ;;  %v257_v22 = vsel %vm111_vm1, %v106_v18, 0  ;;  %v97_v25 = vld [vmem:[#allocation5 + $0x50] sm:$0xff]  ;;  %v98_v26 = vld [vmem:[#allocation5 + $0x58] sm:$0xff]  ;;  %v67_v27 = vld [vmem:[#allocation2 + $0x20] sm:$0xff]  ;;  %v107_v31 = vpack.c.bf16 %v96_v24, %v95_v23 }
  0x2c   :  { %1269 = vmatprep.subr.bf16.mxu1 %v1533_v0  ;;  %v68_v28 = vld [vmem:[#allocation2 + $0x28] sm:$0xff]  ;;  %v69_v29 = vld [vmem:[#allocation2 + $0x30] sm:$0xff]  ;;  %v70_v30 = vld [vmem:[#allocation2 + $0x38] sm:$0xff]  ;;  %v108_v32 = vpack.c.bf16 %v98_v26, %v97_v25 }
  0x2d   :  { %v81_v33 = vpack.c.bf16 %v68_v28, %v67_v27  ;;  %v82_v34 = vpack.c.bf16 %v70_v30, %v69_v29  ;;  %v304_v35 = vsel %vm111_vm1, %v107_v31, 0  ;;  %v99_v37 = vld [vmem:[#allocation5 + $0x60] sm:$0xff]  ;;  %v100_v38 = vld [vmem:[#allocation5 + $0x68] sm:$0xff]  ;;  %v101_v39 = vld [vmem:[#allocation5 + $0x70] sm:$0xff] }
  0x2e   :  { %v351_v36 = vsel %vm111_vm1, %v108_v32, 0  ;;  %v102_v40 = vld [vmem:[#allocation5 + $0x78] sm:$0xff]  ;;  %v71_v41 = vld [vmem:[#allocation2 + $0x40] sm:$0xff]  ;;  %v72_v42 = vld [vmem:[#allocation2 + $0x48] sm:$0xff]  ;;  %v109_v45 = vpack.c.bf16 %v100_v38, %v99_v37 }
  0x2f   :  { %v73_v43 = vld [vmem:[#allocation2 + $0x50] sm:$0xff]  ;;  %v74_v44 = vld [vmem:[#allocation2 + $0x58] sm:$0xff]  ;;  %v110_v46 = vpack.c.bf16 %v102_v40, %v101_v39  ;;  %v83_v47 = vpack.c.bf16 %v72_v42, %v71_v41  ;;  %v75_v51 = vld [vmem:[#allocation2 + $0x60] sm:$0xff] }
  0x30   :  { %v84_v48 = vpack.c.bf16 %v74_v44, %v73_v43  ;;  %v398_v49 = vsel %vm111_vm1, %v109_v45, 0  ;;  %v76_v52 = vld [vmem:[#allocation2 + $0x68] sm:$0xff]  ;;  %v77_v53 = vld [vmem:[#allocation2 + $0x70] sm:$0xff]  ;;  %v78_v54 = vld [vmem:[#allocation2 + $0x78] sm:$0xff] }
  0x31   :  { %1254 = vmatmul.mubr.msk.bf16.vlgmr.msra.gmra.mxu0 %vm111_vm1, %v79_v19  ;;  %v445_v50 = vsel %vm111_vm1, %v110_v46, 0  ;;  %v85_v55 = vpack.c.bf16 %v76_v52, %v75_v51  ;;  %v86_v56 = vpack.c.bf16 %v78_v54, %v77_v53  ;;  %v504_v58 = vld [vmem:[%s1898_s3] sm:$0x1]  ;;  %v505_v59 = vld [vmem:[%s1898_s3 + $0x1] sm:$0x1] }
  0x32   :  { %1260 = vmatmul.mubr.msk.bf16.vlgmr.msra.gmra.mxu1 %vm111_vm1, %v80_v20  ;;  %1264 = vmatpush3.bf16.xpose.msra.mxu0 %v210_v21  ;;  %v512_v61 = vunpack.c.l.bf16 %v504_v58  ;;  %v513_v62 = vunpack.c.l.bf16 %v505_v59  ;;  %v506_v3 = vld [vmem:[%s1898_s3 + $0x2] sm:$0x1]  ;;  %v507_v4 = vld [vmem:[%s1898_s3 + $0x3] sm:$0x1]  ;;  %v508_v20 = vld [vmem:[%s1898_s3 + $0x4] sm:$0x1] }
  0x33   :  { %1270 = vmatpush3.bf16.xpose.msra.mxu1 %v257_v22  ;;  %1265 = vmatprep.mubr.msk.bf16.mxu0 %vm1534_vm0, %v1533_v0  ;;  %v514_v6 = vunpack.c.l.bf16 %v506_v3  ;;  %v515_v9 = vunpack.c.l.bf16 %v507_v4  ;;  %v509_v24 = vld [vmem:[%s1898_s3 + $0x5] sm:$0x1]  ;;  %v516_v31 = vunpack.c.l.bf16 %v508_v20  ;;  %v511_v52 = vld [vmem:[%s1898_s3 + $0x7] sm:$0x1] }
  0x34   :  { %1271 = vmatprep.mubr.msk.bf16.mxu1 %vm1534_vm0, %v1533_v0  ;;  %1275 = vmatprep.subr.bf16.mxu0 %v1533_v0  ;;  %v520_v1 = vmul.f32 -1e+30, %v512_v61  ;;  %v521_v2 = vmul.f32 -1e+30, %v513_v62  ;;  %v519_v62 = vunpack.c.l.bf16 %v511_v52 }
  0x35   :  { %1281 = vmatprep.subr.bf16.mxu1 %v1533_v0  ;;  %v522_v16 = vmul.f32 -1e+30, %v514_v6  ;;  %v523_v19 = vmul.f32 -1e+30, %v515_v9  ;;  %v524_v44 = vmul.f32 -1e+30, %v516_v31 }
  0x36   :  { %v531_v5 = vrot.slane %v520_v1, %v1637_v63  ;;  %v535_v8 = vrot.slane %v521_v2, %v1637_v63 }
  0x37   :  { %v539_v30 = vrot.slane %v522_v16, %v1637_v63  ;;  %v547_v58 = vrot.slane %v524_v44, %v1637_v63 }
  0x39   :  { %1266 = vmatmul.mubr.msk.bf16.vlgmr.msra.gmra.mxu0 %vm111_vm1, %v81_v33 }
  0x3a   :  { %1272 = vmatmul.mubr.msk.bf16.vlgmr.msra.gmra.mxu1 %vm111_vm1, %v82_v34  ;;  %1276 = vmatpush3.bf16.xpose.msra.mxu0 %v304_v35  ;;  %v543_v34 = vrot.slane %v523_v19, %v1637_v63  ;;  %v517_v35 = vunpack.c.l.bf16 %v509_v24 }
  0x3b   :  { %1282 = vmatpush3.bf16.xpose.msra.mxu1 %v351_v36  ;;  %1277 = vmatprep.mubr.msk.bf16.mxu0 %vm1534_vm0, %v1533_v0 }
  0x3c   :  { %1283 = vmatprep.mubr.msk.bf16.mxu1 %vm1534_vm0, %v1533_v0  ;;  %1287 = vmatprep.subr.bf16.mxu0 %v1533_v0 }
  0x3d   :  { %1293 = vmatprep.subr.bf16.mxu1 %v1533_v0 }
  0x41   :  { %1278 = vmatmul.mubr.msk.bf16.vlgmr.msra.gmra.mxu0 %vm111_vm1, %v83_v47  ;;  %v525_v47 = vmul.f32 -1e+30, %v517_v35 }
  0x42   :  { %1284 = vmatmul.mubr.msk.bf16.vlgmr.msra.gmra.mxu1 %vm111_vm1, %v84_v48  ;;  %1288 = vmatpush3.bf16.xpose.msra.mxu0 %v398_v49  ;;  %v510_v48 = vld [vmem:[%s1898_s3 + $0x6] sm:$0x1]  ;;  %s1535_s3 = smov [#allocation9]  }
  0x43   :  { %1294 = vmatpush3.bf16.xpose.msra.mxu1 %v445_v50  ;;  %1289 = vmatprep.mubr.msk.bf16.mxu0 %vm1534_vm0, %v1533_v0  ;;  %v518_v59 = vunpack.c.l.bf16 %v510_v48  ;;  %v551_v61 = vrot.slane %v525_v47, %v1637_v63  ;;  %s1186_s25 = sshll.u32 %s1535_s3, 4  ;;  %s1187_s25 = int_to_ptr.vmem [resolvable:$true] %s1186_s25 }
  0x44   :  { %1295 = vmatprep.mubr.msk.bf16.mxu1 %vm1534_vm0, %v1533_v0  ;;  %1299 = vmatprep.subr.bf16.mxu0 %v1533_v0  ;;  %s1480_s26 = scalar_lea.vmem %s1187_s25, 2048  ;;  %p1485_p2 = scmp.lt.s32.totalorder %s1187_s25, %s1187_s25 }
  0x45   :  { %1305 = vmatprep.subr.bf16.mxu1 %v1533_v0  ;;  %v526_v9 = vmul.f32 -1e+30, %v518_v59  ;;  %p1481_p1 = scmp.ne.s32.totalorder %s1187_s25, %s1480_s26  ;;  %p1486_p3 = scmp.lt.s32.totalorder %s1480_s26, %s1480_s26 }
  0x47   :  { %v555_v24 = vrot.slane %v526_v9, %v1637_v63  ;;  %p1487_p4 = por %p1486_p3, %p1485_p2 }
  0x49   :  { %1290 = vmatmul.mubr.msk.bf16.vlgmr.msra.gmra.mxu0 %vm111_vm1, %v85_v55  ;;  %p1488_p5 = pnand %p1487_p4, %p1481_p1 }
  0x4a   :  { %1296 = vmatmul.mubr.msk.bf16.vlgmr.msra.gmra.mxu1 %vm111_vm1, %v86_v56  ;;  %1301 = vmatprep.mubr.msk.bf16.mxu0 %vm1534_vm0, %v1533_v0 }
  0x4b   :  { %1307 = vmatprep.mubr.msk.bf16.mxu1 %vm1534_vm0, %v1533_v0 }
  0xf1   :  { %v152_v7 = vpop.f32.mrf.mxu0 }
  0xf2   :  { %v488_v10 = vmul.f32 0.125, %v152_v7  ;;  %v199_v11 = vpop.f32.mrf.mxu1 }
  0xf3   :  { %v490_v12 = vmul.f32 0.125, %v199_v11  ;;  %v1255_v13 = vpop.f32.mrf.mxu0 }
  0xf4   :  { %v1261_v14 = vpop.f32.mrf.mxu1  ;;  %v1647_v15 = vadd.f32 %v531_v5, %v488_v10 }
  0xf5   :  { %v155_v17 = vpop.f32.mrf.mxu0  ;;  %v1649_v18 = vadd.f32 %v535_v8, %v490_v12  ;;  %v527_v12 = vmul.f32 -1e+30, %v519_v62 }
  0xf6   :  { %v489_v21 = vmul.f32 0.125, %v155_v17  ;;  %v202_v22 = vpop.f32.mrf.mxu1  ;;  %v577_v23 = vsel %vm576_vm2, %v1647_v15, -inf }
  0xf7   :  { %v491_v25 = vmul.f32 0.125, %v202_v22  ;;  %v583_v26 = vsel %vm576_vm2, %v1649_v18, -inf  ;;  %578 = vmax.xlane.f32.xlu0 %v577_v23  ;;  %v1256_v27 = vpop.f32.mrf.mxu0 }
  0xf8   :  { %584 = vmax.xlane.f32.xlu1 %v583_v26  ;;  %v1262_v28 = vpop.f32.mrf.mxu1  ;;  %v1661_v29 = vadd.f32 %v531_v5, %v489_v21  ;;  %v559_v26 = vrot.slane %v527_v12, %v1637_v63 }
  0xf9   :  { %v246_v32 = vpop.f32.mrf.mxu0  ;;  %v1664_v33 = vadd.f32 %v535_v8, %v491_v25 }
  0xfa   :  { %v492_v36 = vmul.f32 0.125, %v246_v32  ;;  %v293_v37 = vpop.f32.mrf.mxu1  ;;  %v580_v38 = vsel %vm576_vm2, %v1661_v29, -inf }
  0xfb   :  { %v494_v39 = vmul.f32 0.125, %v293_v37  ;;  %v586_v40 = vsel %vm576_vm2, %v1664_v33, -inf  ;;  %581 = vmax.xlane.f32.xlu0 %v580_v38  ;;  %v1267_v41 = vpop.f32.mrf.mxu0 }
  0xfc   :  { %587 = vmax.xlane.f32.xlu1 %v586_v40  ;;  %v1273_v42 = vpop.f32.mrf.mxu1  ;;  %v1671_v43 = vadd.f32 %v539_v30, %v492_v36 }
  0xfd   :  { %v249_v45 = vpop.f32.mrf.mxu0  ;;  %v1673_v46 = vadd.f32 %v543_v34, %v494_v39 }
  0xfe   :  { %v493_v49 = vmul.f32 0.125, %v249_v45  ;;  %v296_v50 = vpop.f32.mrf.mxu1  ;;  %v589_v51 = vsel %vm576_vm2, %v1671_v43, -inf }
  0xff   :  { %v495_v53 = vmul.f32 0.125, %v296_v50  ;;  %590 = vmax.xlane.f32.xlu0 %v589_v51  ;;  %v1268_v54 = vpop.f32.mrf.mxu0  ;;  %v595_v56 = vsel %vm576_vm2, %v1673_v46, -inf }
 0x100   :  { %v1274_v55 = vpop.f32.mrf.mxu1  ;;  %v1685_v57 = vadd.f32 %v539_v30, %v493_v49 }
 0x101   :  { %v340_v60 = vpop.f32.mrf.mxu0  ;;  %v1691_v4 = vadd.f32 %v543_v34, %v495_v53 }
 0x102   :  { %v496_v1 = vmul.f32 0.125, %v340_v60  ;;  %v387_v2 = vpop.f32.mrf.mxu1  ;;  %v592_v3 = vsel %vm576_vm2, %v1685_v57, -inf }
 0x103   :  { %v498_v5 = vmul.f32 0.125, %v387_v2  ;;  %596 = vmax.xlane.f32.xlu0 %v595_v56  ;;  %593 = vmax.xlane.f32.xlu1 %v592_v3  ;;  %v1279_v6 = vpop.f32.mrf.mxu0  ;;  %v598_v16 = vsel %vm576_vm2, %v1691_v4, -inf }
 0x104   :  { %v1285_v7 = vpop.f32.mrf.mxu1  ;;  %v1693_v8 = vadd.f32 %v547_v58, %v496_v1 }
 0x105   :  { %v343_v10 = vpop.f32.mrf.mxu0  ;;  %v1695_v11 = vadd.f32 %v551_v61, %v498_v5 }
 0x106   :  { %v497_v13 = vmul.f32 0.125, %v343_v10  ;;  %v390_v14 = vpop.f32.mrf.mxu1  ;;  %v601_v17 = vsel %vm576_vm2, %v1693_v8, -inf }
 0x107   :  { %v499_v19 = vmul.f32 0.125, %v390_v14  ;;  %599 = vmax.xlane.f32.xlu1 %v598_v16  ;;  %602 = vmax.xlane.f32.xlu0 %v601_v17  ;;  %v1280_v20 = vpop.f32.mrf.mxu0  ;;  %v607_v22 = vsel %vm576_vm2, %v1695_v11, -inf }
 0x108   :  { %v1286_v21 = vpop.f32.mrf.mxu1  ;;  %v1703_v23 = vadd.f32 %v547_v58, %v497_v13 }
 0x109   :  { %v434_v25 = vpop.f32.mrf.mxu0  ;;  %v1709_v31 = vadd.f32 %v551_v61, %v499_v19 }
 0x10a   :  { %v500_v27 = vmul.f32 0.125, %v434_v25  ;;  %v481_v28 = vpop.f32.mrf.mxu1  ;;  %v604_v30 = vsel %vm576_vm2, %v1703_v23, -inf }
 0x10b   :  { %v502_v32 = vmul.f32 0.125, %v481_v28  ;;  %608 = vmax.xlane.f32.xlu0 %v607_v22  ;;  %605 = vmax.xlane.f32.xlu1 %v604_v30  ;;  %v1291_v34 = vpop.f32.mrf.mxu0  ;;  %v610_v63 = vsel %vm576_vm2, %v1709_v31, -inf }
 0x10c   :  { %v1297_v35 = vpop.f32.mrf.mxu1  ;;  %v1711_v36 = vadd.f32 %v555_v24, %v500_v27 }
 0x10d   :  { %v437_v37 = vpop.f32.mrf.mxu0  ;;  %v1713_v38 = vadd.f32 %v559_v26, %v502_v32 }
 0x10e   :  { %v501_v39 = vmul.f32 0.125, %v437_v37  ;;  %v484_v40 = vpop.f32.mrf.mxu1  ;;  %v613_v41 = vsel %vm576_vm2, %v1711_v36, -inf }
 0x10f   :  { %v503_v42 = vmul.f32 0.125, %v484_v40  ;;  %611 = vmax.xlane.f32.xlu1 %v610_v63  ;;  %614 = vmax.xlane.f32.xlu0 %v613_v41  ;;  %v1292_v44 = vpop.f32.mrf.mxu0  ;;  %v619_v47 = vsel %vm576_vm2, %v1713_v38, -inf }
 0x110   :  { %v1298_v45 = vpop.f32.mrf.mxu1  ;;  %v1721_v48 = vadd.f32 %v555_v24, %v501_v39 }
 0x111   :  { %v1725_v50 = vadd.f32 %v559_v26, %v503_v42 }
 0x112   :  { %v616_v49 = vsel %vm576_vm2, %v1721_v48, -inf }
 0x113   :  { %620 = vmax.xlane.f32.xlu0 %v619_v47  ;;  %617 = vmax.xlane.f32.xlu1 %v616_v49  ;;  %v622_v51 = vsel %vm576_vm2, %v1725_v50, -inf }
 0x117   :  { %623 = vmax.xlane.f32.xlu1 %v622_v51 }
 0x180   :  { %v579_v52 = vpop.xlane.xlu0 %578 }
 0x181   :  { %v585_v53 = vpop.xlane.xlu1 %584  ;;  %v625_v54 = vsub.f32 %v1647_v15, %v579_v52 }
 0x182   :  { %v627_v55 = vsub.f32 %v1649_v18, %v585_v53 }
 0x183   :  { %v641_v56 = vmul.f32 1.442695, %v625_v54 }
 0x184   :  { %v645_v58 = vmul.f32 1.442695, %v627_v55  ;;  %v582_v59 = vpop.xlane.xlu0 %581 }
 0x185   :  { %1356 = vpow2.f32 %v641_v56  ;;  %v588_v60 = vpop.xlane.xlu1 %587  ;;  %v626_v61 = vsub.f32 %v1661_v29, %v582_v59 }
 0x186   :  { %v628_v62 = vsub.f32 %v1664_v33, %v588_v60  ;;  %1358 = vpow2.f32 %v645_v58 }
 0x187   :  { %v643_v1 = vmul.f32 1.442695, %v626_v61 }
 0x188   :  { %v647_v2 = vmul.f32 1.442695, %v628_v62  ;;  %v591_v3 = vpop.xlane.xlu0 %590 }
 0x189   :  { %1360 = vpow2.f32 %v643_v1  ;;  %v629_v5 = vsub.f32 %v1671_v43, %v591_v3 }
 0x18a   :  { %1362 = vpow2.f32 %v647_v2 }
 0x18b   :  { %v649_v15 = vmul.f32 1.442695, %v629_v5 }
 0x18c   :  { %v597_v6 = vpop.xlane.xlu0 %596  ;;  %v594_v18 = vpop.xlane.xlu1 %593 }
 0x18d   :  { %1364 = vpow2.f32 %v649_v15  ;;  %v631_v7 = vsub.f32 %v1673_v46, %v597_v6  ;;  %v630_v9 = vsub.f32 %v1685_v57, %v594_v18  ;;  %v737_v6 = vld [vmem:[#allocation7] sm:$0xff]  ;;  %v738_v18 = vld [vmem:[#allocation7 + $0x8] sm:$0xff] }
 0x18f   :  { %v653_v10 = vmul.f32 1.442695, %v631_v7  ;;  %v651_v29 = vmul.f32 1.442695, %v630_v9  ;;  %v739_v7 = vld [vmem:[#allocation7 + $0x10] sm:$0xff]  ;;  %v753_v9 = vpack.c.bf16 %v738_v18, %v737_v6 }
 0x190   :  { %v600_v12 = vpop.xlane.xlu1 %599  ;;  %v603_v33 = vpop.xlane.xlu0 %602 }
 0x191   :  { %1366 = vpow2.f32 %v653_v10  ;;  %v632_v13 = vsub.f32 %v1691_v4, %v600_v12  ;;  %v633_v14 = vsub.f32 %v1693_v8, %v603_v33  ;;  %v740_v10 = vld [vmem:[#allocation7 + $0x18] sm:$0xff]  ;;  %1300 = vmatpush3.bf16.msra.mxu0 %v753_v9 }
 0x192   :  { %v1738_v16 = vpop.eup %1356  ;;  %1368 = vpow2.f32 %v651_v29  ;;  %v754_v12 = vpack.c.bf16 %v740_v10, %v739_v7  ;;  %1311 = vmatprep.subr.bf16.mxu0 %v1533_v0  ;;  %v749_v10 = vld [vmem:[#allocation7 + $0x60] sm:$0xff] }
 0x193   :  { %v655_v43 = vmul.f32 1.442695, %v632_v13  ;;  %v657_v17 = vmul.f32 1.442695, %v633_v14  ;;  %v673_v19 = vsel %vm576_vm2, %v1738_v16, 0.0  ;;  %v1742_v46 = vpop.eup %1358 }
 0x194   :  { %v609_v57 = vpop.xlane.xlu0 %608  ;;  %v606_v20 = vpop.xlane.xlu1 %605  ;;  %674 = vadd.xlane.f32.xlu0 %v673_v19  ;;  %v679_v25 = vsel %vm576_vm2, %v1742_v46, 0.0  ;;  %1306 = vmatpush3.bf16.msra.mxu1 %v754_v12  ;;  %v750_v12 = vld [vmem:[#allocation7 + $0x68] sm:$0xff] }
 0x195   :  { %1370 = vpow2.f32 %v655_v43  ;;  %v635_v21 = vsub.f32 %v1695_v11, %v609_v57  ;;  %v634_v4 = vsub.f32 %v1703_v23, %v606_v20  ;;  %1317 = vmatprep.subr.bf16.mxu1 %v1533_v0 }
 0x196   :  { %v1746_v22 = vpop.eup %1360  ;;  %1372 = vpow2.f32 %v657_v17 }
 0x197   :  { %v661_v8 = vmul.f32 1.442695, %v635_v21  ;;  %v659_v24 = vmul.f32 1.442695, %v634_v4  ;;  %v676_v26 = vsel %vm576_vm2, %v1746_v22, 0.0  ;;  %v1752_v27 = vpop.eup %1362 }
 0x198   :  { %v612_v28 = vpop.xlane.xlu1 %611  ;;  %680 = vadd.xlane.f32.xlu0 %v679_v25  ;;  %v615_v30 = vpop.xlane.xlu0 %614  ;;  %677 = vadd.xlane.f32.xlu1 %v676_v26  ;;  %v682_v39 = vsel %vm576_vm2, %v1752_v27, 0.0  ;;  %v741_v26 = vld [vmem:[#allocation7 + $0x20] sm:$0xff] }
 0x199   :  { %1374 = vpow2.f32 %v661_v8  ;;  %v636_v11 = vsub.f32 %v1709_v31, %v612_v28  ;;  %v637_v23 = vsub.f32 %v1711_v36, %v615_v30  ;;  %v742_v28 = vld [vmem:[#allocation7 + $0x28] sm:$0xff] }
 0x19a   :  { %v1756_v32 = vpop.eup %1364  ;;  %1376 = vpow2.f32 %v659_v24 }
 0x19b   :  { %v663_v34 = vmul.f32 1.442695, %v636_v11  ;;  %v665_v35 = vmul.f32 1.442695, %v637_v23  ;;  %v685_v37 = vsel %vm576_vm2, %v1756_v32, 0.0 }
 0x19c   :  { %686 = vadd.xlane.f32.xlu0 %v685_v37  ;;  %v621_v40 = vpop.xlane.xlu0 %620  ;;  %683 = vadd.xlane.f32.xlu1 %v682_v39  ;;  %v618_v63 = vpop.xlane.xlu1 %617  ;;  %v755_v37 = vpack.c.bf16 %v742_v28, %v741_v26 }
 0x19d   :  { %1378 = vpow2.f32 %v663_v34  ;;  %v639_v31 = vsub.f32 %v1713_v38, %v621_v40  ;;  %v638_v36 = vsub.f32 %v1721_v48, %v618_v63  ;;  %v743_v40 = vld [vmem:[#allocation7 + $0x30] sm:$0xff]  ;;  %v744_v63 = vld [vmem:[#allocation7 + $0x38] sm:$0xff] }
 0x19e   :  { %v1764_v41 = vpop.eup %1366  ;;  %1380 = vpow2.f32 %v665_v35 }
 0x19f   :  { %v1766_v42 = vpop.eup %1368  ;;  %v669_v44 = vmul.f32 1.442695, %v639_v31  ;;  %v667_v45 = vmul.f32 1.442695, %v638_v36  ;;  %v691_v47 = vsel %vm576_vm2, %v1764_v41, 0.0 }
 0x1a0   :  { %692 = vadd.xlane.f32.xlu0 %v691_v47  ;;  %v688_v49 = vsel %vm576_vm2, %v1766_v42, 0.0  ;;  %v624_v51 = vpop.xlane.xlu1 %623 }
 0x1a1   :  { %1382 = vpow2.f32 %v669_v44  ;;  %689 = vadd.xlane.f32.xlu1 %v688_v49  ;;  %v640_v38 = vsub.f32 %v1725_v50, %v624_v51  ;;  %v746_v51 = vld [vmem:[#allocation7 + $0x48] sm:$0xff] }
 0x1a2   :  { %v1773_v48 = vpop.eup %1370  ;;  %1384 = vpow2.f32 %v667_v45  ;;  %v756_v45 = vpack.c.bf16 %v744_v63, %v743_v40 }
 0x1a3   :  { %v1775_v52 = vpop.eup %1372  ;;  %v671_v53 = vmul.f32 1.442695, %v640_v38  ;;  %v694_v54 = vsel %vm576_vm2, %v1773_v48, 0.0 }
 0x1a4   :  { %v697_v55 = vsel %vm576_vm2, %v1775_v52, 0.0 }
 0x1a5   :  { %1386 = vpow2.f32 %v671_v53  ;;  %698 = vadd.xlane.f32.xlu0 %v697_v55  ;;  %695 = vadd.xlane.f32.xlu1 %v694_v54 }
 0x1a6   :  { %v1781_v56 = vpop.eup %1374 }
 0x1a7   :  { %v1783_v58 = vpop.eup %1376  ;;  %v703_v50 = vsel %vm576_vm2, %v1781_v56, 0.0 }
 0x1a8   :  { %v700_v59 = vsel %vm576_vm2, %v1783_v58, 0.0 }
 0x1a9   :  { %704 = vadd.xlane.f32.xlu0 %v703_v50  ;;  %701 = vadd.xlane.f32.xlu1 %v700_v59 }
 0x1aa   :  { %v1789_v60 = vpop.eup %1378 }
 0x1ab   :  { %v1791_v61 = vpop.eup %1380  ;;  %v706_v62 = vsel %vm576_vm2, %v1789_v60, 0.0 }
 0x1ac   :  { %v709_v1 = vsel %vm576_vm2, %v1791_v61, 0.0 }
 0x1ad   :  { %710 = vadd.xlane.f32.xlu0 %v709_v1  ;;  %707 = vadd.xlane.f32.xlu1 %v706_v62  ;;  %v747_v62 = vld [vmem:[#allocation7 + $0x50] sm:$0xff]  ;;  %v748_v1 = vld [vmem:[#allocation7 + $0x58] sm:$0xff] }
 0x1ae   :  { %v1797_v2 = vpop.eup %1382  ;;  %v758_v18 = vpack.c.bf16 %v748_v1, %v747_v62 }
 0x1af   :  { %v1799_v3 = vpop.eup %1384  ;;  %v715_v5 = vsel %vm576_vm2, %v1797_v2, 0.0 }
 0x1b0   :  { %v712_v15 = vsel %vm576_vm2, %v1799_v3, 0.0 }
 0x1b1   :  { %716 = vadd.xlane.f32.xlu0 %v715_v5  ;;  %713 = vadd.xlane.f32.xlu1 %v712_v15 }
 0x1b2   :  { %v1805_v29 = vpop.eup %1386 }
 0x1b3   :  { %v718_v33 = vsel %vm576_vm2, %v1805_v29, 0.0 }
 0x1b5   :  { %719 = vadd.xlane.f32.xlu1 %v718_v33 }
 0x21d   :  { %v675_v13 = vpop.xlane.xlu0 %674 }
 0x21e   :  { %1388 = vrcp.f32 %v675_v13  ;;  %v759_v13 = vpack.c.bf16 %v750_v12, %v749_v10 }
 0x221   :  { %v681_v14 = vpop.xlane.xlu0 %680  ;;  %v678_v43 = vpop.xlane.xlu1 %677 }
 0x222   :  { %1390 = vrcp.f32 %v681_v14 }
 0x223   :  { %1392 = vrcp.f32 %v678_v43 }
 0x225   :  { %v687_v17 = vpop.xlane.xlu0 %686  ;;  %v684_v19 = vpop.xlane.xlu1 %683 }
 0x226   :  { %1394 = vrcp.f32 %v687_v17  ;;  %v751_v17 = vld [vmem:[#allocation7 + $0x70] sm:$0xff] }
 0x227   :  { %1396 = vrcp.f32 %v684_v19  ;;  %v752_v19 = vld [vmem:[#allocation7 + $0x78] sm:$0xff] }
 0x229   :  { %v693_v57 = vpop.xlane.xlu0 %692 }
 0x22a   :  { %1398 = vrcp.f32 %v693_v57  ;;  %v690_v20 = vpop.xlane.xlu1 %689 }
 0x22b   :  { %v1389_v21 = vpop.eup %1388  ;;  %1400 = vrcp.f32 %v690_v20  ;;  %v760_v20 = vpack.c.bf16 %v752_v19, %v751_v17 }
 0x22c   :  { %v761_v4 = vmul.f32 %v1389_v21, %v1738_v16 }
 0x22e   :  { %v699_v8 = vpop.xlane.xlu0 %698  ;;  %v696_v24 = vpop.xlane.xlu1 %695  ;;  %777 = vst.msk [vmem:[#allocation9] sm:$0xff] %vm576_vm2, %v761_v4 }
 0x22f   :  { %v1391_v25 = vpop.eup %1390  ;;  %1402 = vrcp.f32 %v699_v8 }
 0x230   :  { %v1393_v30 = vpop.eup %1392  ;;  %1404 = vrcp.f32 %v696_v24  ;;  %v763_v11 = vmul.f32 %v1391_v25, %v1742_v46 }
 0x231   :  { %v762_v23 = vmul.f32 %v1393_v30, %v1746_v22 }
 0x232   :  { %v705_v34 = vpop.xlane.xlu0 %704  ;;  %v702_v35 = vpop.xlane.xlu1 %701  ;;  %779 = vst.msk [vmem:[#allocation9 + $0x10] sm:$0xff] %vm576_vm2, %v763_v11 }
 0x233   :  { %v1395_v16 = vpop.eup %1394  ;;  %1406 = vrcp.f32 %v705_v34  ;;  %778 = vst.msk [vmem:[#allocation9 + $0x8] sm:$0xff] %vm576_vm2, %v762_v23  ;;  %v793_v39 = vpack.c.bf16 %v762_v23, %v761_v4 }
 0x234   :  { %v1397_v31 = vpop.eup %1396  ;;  %1408 = vrcp.f32 %v702_v35  ;;  %v765_v36 = vmul.f32 %v1395_v16, %v1756_v32  ;;  %v745_v32 = vld [vmem:[#allocation7 + $0x40] sm:$0xff] }
 0x235   :  { %1302 = vmatmul.mubr.msk.bf16.vlgmr.msra.gmra.mxu0 %vm576_vm2, %v793_v39  ;;  %v764_v46 = vmul.f32 %v1397_v31, %v1752_v27  ;;  %v757_v50 = vpack.c.bf16 %v746_v51, %v745_v32 }
 0x236   :  { %v711_v22 = vpop.xlane.xlu0 %710  ;;  %v708_v44 = vpop.xlane.xlu1 %707  ;;  %1312 = vmatpush3.bf16.msra.mxu0 %v755_v37  ;;  %1313 = vmatprep.mubr.msk.bf16.mxu0 %vm1534_vm0, %v1533_v0  ;;  %781 = vst.msk [vmem:[#allocation9 + $0x20] sm:$0xff] %vm576_vm2, %v765_v36 }
 0x237   :  { %v1399_v47 = vpop.eup %1398  ;;  %1410 = vrcp.f32 %v711_v22  ;;  %780 = vst.msk [vmem:[#allocation9 + $0x18] sm:$0xff] %vm576_vm2, %v764_v46  ;;  %v794_v49 = vpack.c.bf16 %v764_v46, %v763_v11  ;;  %1323 = vmatprep.subr.bf16.mxu0 %v1533_v0 }
 0x238   :  { %v1401_v38 = vpop.eup %1400  ;;  %1412 = vrcp.f32 %v708_v44  ;;  %v767_v27 = vmul.f32 %v1399_v47, %v1764_v41 }
 0x239   :  { %1308 = vmatmul.mubr.msk.bf16.vlgmr.msra.gmra.mxu1 %vm576_vm2, %v794_v49  ;;  %v766_v53 = vmul.f32 %v1401_v38, %v1766_v42 }
 0x23a   :  { %v717_v54 = vpop.xlane.xlu0 %716  ;;  %1318 = vmatpush3.bf16.msra.mxu1 %v756_v45  ;;  %v714_v55 = vpop.xlane.xlu1 %713  ;;  %1319 = vmatprep.mubr.msk.bf16.mxu1 %vm1534_vm0, %v1533_v0  ;;  %783 = vst.msk [vmem:[#allocation9 + $0x30] sm:$0xff] %vm576_vm2, %v767_v27 }
 0x23b   :  { %1414 = vrcp.f32 %v717_v54  ;;  %782 = vst.msk [vmem:[#allocation9 + $0x28] sm:$0xff] %vm576_vm2, %v766_v53  ;;  %v795_v59 = vpack.c.bf16 %v766_v53, %v765_v36  ;;  %1329 = vmatprep.subr.bf16.mxu1 %v1533_v0 }
 0x23c   :  { %v1403_v41 = vpop.eup %1402  ;;  %1416 = vrcp.f32 %v714_v55 }
 0x23d   :  { %v1405_v42 = vpop.eup %1404  ;;  %1314 = vmatmul.mubr.msk.bf16.vlgmr.msra.gmra.mxu0 %vm576_vm2, %v795_v59  ;;  %v769_v5 = vmul.f32 %v1403_v41, %v1775_v52 }
 0x23e   :  { %v720_v15 = vpop.xlane.xlu1 %719  ;;  %v768_v6 = vmul.f32 %v1405_v42, %v1773_v48  ;;  %1324 = vmatpush3.bf16.msra.mxu0 %v757_v50  ;;  %1325 = vmatprep.mubr.msk.bf16.mxu0 %vm1534_vm0, %v1533_v0 }
 0x23f   :  { %1418 = vrcp.f32 %v720_v15  ;;  %785 = vst.msk [vmem:[#allocation9 + $0x40] sm:$0xff] %vm576_vm2, %v769_v5  ;;  %1335 = vmatprep.subr.bf16.mxu0 %v1533_v0 }
 0x240   :  { %v1407_v7 = vpop.eup %1406  ;;  %784 = vst.msk [vmem:[#allocation9 + $0x38] sm:$0xff] %vm576_vm2, %v768_v6  ;;  %v796_v9 = vpack.c.bf16 %v768_v6, %v767_v27 }
 0x241   :  { %v1409_v52 = vpop.eup %1408  ;;  %v771_v33 = vmul.f32 %v1407_v7, %v1781_v56 }
 0x242   :  { %1320 = vmatmul.mubr.msk.bf16.vlgmr.msra.gmra.mxu1 %vm576_vm2, %v796_v9  ;;  %v770_v48 = vmul.f32 %v1409_v52, %v1783_v58 }
 0x243   :  { %1330 = vmatpush3.bf16.msra.mxu1 %v758_v18  ;;  %1331 = vmatprep.mubr.msk.bf16.mxu1 %vm1534_vm0, %v1533_v0  ;;  %787 = vst.msk [vmem:[#allocation9 + $0x50] sm:$0xff] %vm576_vm2, %v771_v33 }
 0x244   :  { %v1411_v14 = vpop.eup %1410  ;;  %786 = vst.msk [vmem:[#allocation9 + $0x48] sm:$0xff] %vm576_vm2, %v770_v48  ;;  %v797_v43 = vpack.c.bf16 %v770_v48, %v769_v5  ;;  %1341 = vmatprep.subr.bf16.mxu1 %v1533_v0 }
 0x245   :  { %v1413_v56 = vpop.eup %1412  ;;  %v773_v57 = vmul.f32 %v1411_v14, %v1791_v61 }
 0x246   :  { %1326 = vmatmul.mubr.msk.bf16.vlgmr.msra.gmra.mxu0 %vm576_vm2, %v797_v43  ;;  %v772_v58 = vmul.f32 %v1413_v56, %v1789_v60 }
 0x247   :  { %1336 = vmatpush3.bf16.msra.mxu0 %v759_v13  ;;  %1337 = vmatprep.mubr.msk.bf16.mxu0 %vm1534_vm0, %v1533_v0  ;;  %789 = vst.msk [vmem:[#allocation9 + $0x60] sm:$0xff] %vm576_vm2, %v773_v57 }
 0x248   :  { %v1415_v21 = vpop.eup %1414  ;;  %788 = vst.msk [vmem:[#allocation9 + $0x58] sm:$0xff] %vm576_vm2, %v772_v58  ;;  %v798_v4 = vpack.c.bf16 %v772_v58, %v771_v33 }
 0x249   :  { %v1417_v8 = vpop.eup %1416  ;;  %v775_v24 = vmul.f32 %v1415_v21, %v1797_v2 }
 0x24a   :  { %1332 = vmatmul.mubr.msk.bf16.vlgmr.msra.gmra.mxu1 %vm576_vm2, %v798_v4  ;;  %v774_v61 = vmul.f32 %v1417_v8, %v1799_v3 }
 0x24b   :  { %791 = vst.msk [vmem:[#allocation9 + $0x70] sm:$0xff] %vm576_vm2, %v775_v24  ;;  %1342 = vmatpush3.bf16.msra.mxu1 %v760_v20  ;;  %1343 = vmatprep.mubr.msk.bf16.mxu1 %vm1534_vm0, %v1533_v0 }
 0x24c   :  { %v1419_v60 = vpop.eup %1418  ;;  %790 = vst.msk [vmem:[#allocation9 + $0x68] sm:$0xff] %vm576_vm2, %v774_v61  ;;  %v799_v25 = vpack.c.bf16 %v774_v61, %v773_v57 }
 0x24d   :  { %v776_v26 = vmul.f32 %v1419_v60, %v1805_v29 }
 0x24e   :  { %1338 = vmatmul.mubr.msk.bf16.vlgmr.msra.gmra.mxu0 %vm576_vm2, %v799_v25 }
 0x24f   :  { %792 = vst.msk [vmem:[#allocation9 + $0x78] sm:$0xff] %vm576_vm2, %v776_v26  ;;  %v800_v2 = vpack.c.bf16 %v776_v26, %v775_v24 }
 0x252   :  { %1344 = vmatmul.mubr.msk.bf16.vlgmr.msra.gmra.mxu1 %vm576_vm2, %v800_v2 }
 0x253   :  { %1491 = shalt.err (!%p1488_p5)
}
 0x254   :  { %1192 = dma.vmem_to_hbm [thread:$0]  %s1187_s25, 2048, %s1900_s5, [#allocation10], %s1530_s23, %s1530_s23, %s1531_s24  }
 0x255   :  { %s1536_s5 = smov [#allocation8]  }
 0x256   :  { %s1174_s29 = sshll.u32 %s1536_s5, 4  ;;  %s1175_s29 = int_to_ptr.vmem [resolvable:$true] %s1174_s29 }
 0x257   :  { %s1500_s30 = scalar_lea.vmem %s1175_s29, 2048  ;;  %p1505_p7 = scmp.lt.s32.totalorder %s1175_s29, %s1175_s29 }
 0x258   :  { %p1501_p6 = scmp.ne.s32.totalorder %s1175_s29, %s1500_s30  ;;  %p1506_p8 = scmp.lt.s32.totalorder %s1500_s30, %s1500_s30 }
 0x25a   :  { %p1507_p9 = por %p1506_p8, %p1505_p7 }
 0x25c   :  { %p1508_p10 = pnand %p1507_p9, %p1501_p6 }
 0x2f5   :  { %v838_v0 = vpop.f32.mrf.mxu0 }
 0x2f6   :  { %1153 = vst.msk [vmem:[#allocation8] sm:$0xff] %vm111_vm1, %v838_v0 }
 0x2f7   :  { %v1303_v3 = vpop.f32.mrf.mxu0 }
 0x2f9   :  { %v841_v29 = vpop.f32.mrf.mxu0  ;;  %v882_v28 = vpop.f32.mrf.mxu1 }
 0x2fa   :  { %1154 = vst.msk [vmem:[#allocation8 + $0x8] sm:$0xff] %vm111_vm1, %v841_v29  ;;  %1155 = vst.msk [vmem:[#allocation8 + $0x10] sm:$0xff] %vm111_vm1, %v882_v28 }
 0x2fb   :  { %v1304_v30 = vpop.f32.mrf.mxu0  ;;  %v1309_v11 = vpop.f32.mrf.mxu1 }
 0x2fd   :  { %v885_v23 = vpop.f32.mrf.mxu1  ;;  %v926_v34 = vpop.f32.mrf.mxu0 }
 0x2fe   :  { %1156 = vst.msk [vmem:[#allocation8 + $0x18] sm:$0xff] %vm111_vm1, %v885_v23  ;;  %1157 = vst.msk [vmem:[#allocation8 + $0x20] sm:$0xff] %vm111_vm1, %v926_v34 }
 0x2ff   :  { %v1310_v35 = vpop.f32.mrf.mxu1  ;;  %v1315_v37 = vpop.f32.mrf.mxu0 }
 0x301   :  { %v929_v16 = vpop.f32.mrf.mxu0 }
 0x302   :  { %1158 = vst.msk [vmem:[#allocation8 + $0x28] sm:$0xff] %vm111_vm1, %v929_v16  ;;  %v970_v39 = vpop.f32.mrf.mxu1 }
 0x303   :  { %1159 = vst.msk [vmem:[#allocation8 + $0x30] sm:$0xff] %vm111_vm1, %v970_v39  ;;  %v1316_v40 = vpop.f32.mrf.mxu0 }
 0x304   :  { %v1321_v63 = vpop.f32.mrf.mxu1 }
 0x306   :  { %v973_v31 = vpop.f32.mrf.mxu1  ;;  %v1014_v36 = vpop.f32.mrf.mxu0 }
 0x307   :  { %1160 = vst.msk [vmem:[#allocation8 + $0x38] sm:$0xff] %vm111_vm1, %v973_v31  ;;  %1161 = vst.msk [vmem:[#allocation8 + $0x40] sm:$0xff] %vm111_vm1, %v1014_v36 }
 0x308   :  { %v1322_v46 = vpop.f32.mrf.mxu1  ;;  %v1327_v22 = vpop.f32.mrf.mxu0 }
 0x30a   :  { %v1017_v44 = vpop.f32.mrf.mxu0  ;;  %v1058_v45 = vpop.f32.mrf.mxu1 }
 0x30b   :  { %1162 = vst.msk [vmem:[#allocation8 + $0x48] sm:$0xff] %vm111_vm1, %v1017_v44  ;;  %1163 = vst.msk [vmem:[#allocation8 + $0x50] sm:$0xff] %vm111_vm1, %v1058_v45 }
 0x30c   :  { %v1328_v47 = vpop.f32.mrf.mxu0  ;;  %v1333_v49 = vpop.f32.mrf.mxu1 }
 0x30e   :  { %v1061_v32 = vpop.f32.mrf.mxu1  ;;  %v1102_v51 = vpop.f32.mrf.mxu0 }
 0x30f   :  { %1164 = vst.msk [vmem:[#allocation8 + $0x58] sm:$0xff] %vm111_vm1, %v1061_v32  ;;  %1165 = vst.msk [vmem:[#allocation8 + $0x60] sm:$0xff] %vm111_vm1, %v1102_v51 }
 0x310   :  { %v1334_v38 = vpop.f32.mrf.mxu1  ;;  %v1339_v27 = vpop.f32.mrf.mxu0 }
 0x312   :  { %v1105_v53 = vpop.f32.mrf.mxu0  ;;  %v1146_v54 = vpop.f32.mrf.mxu1 }
 0x313   :  { %1166 = vst.msk [vmem:[#allocation8 + $0x68] sm:$0xff] %vm111_vm1, %v1105_v53  ;;  %1167 = vst.msk [vmem:[#allocation8 + $0x70] sm:$0xff] %vm111_vm1, %v1146_v54 }
 0x314   :  { %v1340_v55 = vpop.f32.mrf.mxu0  ;;  %v1345_v50 = vpop.f32.mrf.mxu1 }
 0x316   :  { %v1149_v59 = vpop.f32.mrf.mxu1 }
 0x317   :  { %1168 = vst.msk [vmem:[#allocation8 + $0x78] sm:$0xff] %vm111_vm1, %v1149_v59 }
 0x318   :  { %v1346_v41 = vpop.f32.mrf.mxu1 }
 0x319   :  { %1511 = shalt.err (!%p1508_p10)
}
 0x31a   :  { %1180 = dma.vmem_to_hbm [thread:$0]  %s1175_s29, 2048, %s1899_s4, [#allocation4], %s1530_s23, %s1530_s23, %s1531_s24  }
 0x31b   :  { %1524 = dma.done.wait [#allocation4], 2048  }
 0x31c   :  { %1525 = vsyncadd [#allocation4], 4294965248 }
 0x31d   :  { %1526 = dma.done.wait [#allocation10], 2048  }
 0x31e   :  { %1527 = vsyncadd [#allocation10], 4294965248 }
 0x31f   :  { %1199 = vsyncpa [#allocation3], 1 }
 0x320   :  { %1200 = vsyncpa [#allocation6], 1 }
 0x321   :  { %1201 = vsyncpa [#allocation4], 1 }
 0x322   :  { %1202 = vsyncpa [#allocation10], 1 }

</bundles_post_ra>
